<compile_context>
chip_gen: v5e
topology: v5e:2x2
jax: 0.10.0
libtpu: 0.0.40
codegen_flags: <defaults>
</compile_context>

<pallas_src>
import functools

import jax
import jax.numpy as jnp
from jax.experimental import pallas as pl
from jax.experimental.pallas import tpu as pltpu


def _round_up(x: int, m: int) -> int:
    return ((x + m - 1) // m) * m


def _detect_int8_mxu() -> bool:
    """Best-effort generation check: v5e/v5p/v6e MXUs have an int8 x int8 -> int32 mode;
    v7x does not (fp8 only, not exact for values up to 127) and older generations stay on
    the portable bf16 path."""
    try:
        kind = jax.devices()[0].device_kind.lower()
    except Exception:
        return False
    return ("v5" in kind) or ("v6" in kind)


def quantize_mat(mat):
    """Per-row symmetric int8 quantization (matches torch `quantize_mat`)."""
    max_val = (jnp.max(jnp.abs(mat), axis=-1) / 127.0).astype(mat.dtype)
    q = (mat / max_val[..., None]).astype(jnp.int8)  # trunc toward zero, like torch .to(int8)
    return q, max_val


def _w8x8_kernel(xq_ref, xscale_ref, wq_ref, sb_ref, o_ref, acc_ref, *, use_int8_mxu):
    """One (tm, tn) output tile, accumulated over the K grid axis.

    xq_ref:     (tm, tk) int8 pre-quantized activation tile
    xscale_ref: (tm, 1)  f32 per-row activation scale (abs-max / 127)
    wq_ref:     (tk, tn) int8 quantized weight tile ([K, N] layout)
    sb_ref:     (2, tn)  f32: row 0 = per-out-channel weight scale, row 1 = bias
    o_ref:      (tm, tn) output tile (activation dtype)
    acc_ref:    (tm, tn) accumulator scratch (int32 on the integer-MXU path, else f32),
                resident across the K grid axis
    """
    k = pl.program_id(2)

    @pl.when(k == 0)
    def _init():
        acc_ref[...] = jnp.zeros_like(acc_ref)

    if use_int8_mxu:
        # Native integer MXU (v5e/v6e): bit-exact int32 accumulation, ~2x the bf16 rate,
        # and no per-K-step VPU casts.
        acc_ref[...] += jnp.dot(xq_ref[...], wq_ref[...],
                                preferred_element_type=jnp.int32)
    else:
        # Portable path (v7x has no integer MXU): int values in [-127, 127] are exact in bf16.
        acc_ref[...] += jnp.dot(xq_ref[...].astype(jnp.bfloat16),
                                wq_ref[...].astype(jnp.bfloat16),
                                preferred_element_type=jnp.float32)

    @pl.when(k == pl.num_programs(2) - 1)
    def _finalize():
        w_scale = sb_ref[0:1, :]                    # (1, tn)
        bias = sb_ref[1:2, :]                       # (1, tn)
        mx = xscale_ref[...] * w_scale              # (tm, 1) * (1, tn) -> (tm, tn)
        o_ref[...] = (acc_ref[...].astype(jnp.float32) * mx + bias).astype(o_ref.dtype)


class W8X8Linear:
    """JAX/Pallas port of the PyTorch W8X8Linear forward pass."""

    def __init__(self, ori_w, bias=None, act_max=None, alpha=32,
                 block_n=1024, block_k=1024, use_int8_mxu=None):
        # ori_w: [out_features, in_features]  (nn.Linear weight convention)
        self.dtype = ori_w.dtype
        self.alpha = alpha
        self.scales = None
        if act_max is not None:
            w_col_max = jnp.max(jnp.abs(ori_w), axis=0)              # [in_features]
            self.scales = jnp.clip(
                jnp.power(act_max, alpha) / jnp.power(w_col_max, 1 - alpha),
                1e-5, None).astype(ori_w.dtype)
            ori_w = ori_w * self.scales
        wq, wmax = quantize_mat(ori_w)                               # wq: [N, K] int8, wmax: [N]
        self.weight_q = wq.T                                         # [K, N] int8 (== weight_q.t())
        self.max_val = wmax                                          # [N]
        self.bias = bias
        self.out_features, self.in_features = ori_w.shape
        self.use_int8_mxu = _detect_int8_mxu() if use_int8_mxu is None else bool(use_int8_mxu)

        # ---- kernel-side padded / fused buffers, built once (weight stays int8 end-to-end) ----
        K, N = self.in_features, self.out_features
        self.block_k = min(_round_up(block_k, 128), _round_up(K, 128))
        self.block_n = min(_round_up(block_n, 128), _round_up(N, 128))
        self._k_pad = _round_up(K, self.block_k)
        self._n_pad = _round_up(N, self.block_n)
        self._wq_pad = jnp.pad(self.weight_q,
                               ((0, self._k_pad - K), (0, self._n_pad - N)))
        w_scale_pad = jnp.pad(self.max_val.astype(jnp.float32),
                              (0, self._n_pad - N), constant_values=1.0)
        bias_f32 = (jnp.zeros((N,), jnp.float32) if bias is None
                    else bias.astype(jnp.float32))
        bias_pad = jnp.pad(bias_f32, (0, self._n_pad - N))
        self._scale_bias = jnp.stack([w_scale_pad, bias_pad], axis=0)  # (2, N_pad) f32

    def __call__(self, x, *, block_m=512):
        if self.scales is not None:
            x = x / self.scales                                      # smooth-quant pre-scale (glue)
        orig_shape = x.shape
        K, N = self.in_features, self.out_features
        xm = x.reshape(-1, K)
        M = xm.shape[0]

        tm = min(_round_up(block_m, 32), _round_up(M, 32))
        tn, tk = self.block_n, self.block_k
        m_pad, n_pad, k_pad = _round_up(M, tm), self._n_pad, self._k_pad

        # Keep >= 2 parallel output blocks when possible so both v7x TensorCores get work
        # (harmless no-op on single-TC v5e/v6e).
        if (m_pad // tm) * (n_pad // tn) < 2 and tn >= 256 and (tn // 2) % 128 == 0:
            tn //= 2

        # ---- activation pre-quant: per-row symmetric int8, OUTSIDE the matmul grid ----
        # One reduction + one fused elementwise pass over x; the matmul kernel then streams
        # int8 activations (4x less HBM traffic) and does zero per-tile quantization work.
        x_scale = (jnp.max(jnp.abs(xm), axis=-1) / 127.0).astype(xm.dtype)
        # Clamp so all-zero (and padded) rows quantize to 0 and produce `bias`, instead of
        # the inf/NaN the torch original would produce.
        x_scale = jnp.maximum(x_scale, jnp.asarray(jnp.finfo(jnp.float32).tiny, x_scale.dtype))
        xm_q = (xm / x_scale[:, None]).astype(jnp.int8)   # trunc toward zero == torch .to(int8)

        # Pad the int8 quantized matrix (4x cheaper than padding f32; XLA fuses the pad into
        # the quantize producer) -- the f32 input is never copied.
        xq_pad = jnp.pad(xm_q, ((0, m_pad - M), (0, k_pad - K)))
        xs_pad = jnp.pad(x_scale.astype(jnp.float32), (0, m_pad - M),
                         constant_values=1.0).reshape(m_pad, 1)

        grid = (m_pad // tm, n_pad // tn, k_pad // tk)
        out_itemsize = jnp.dtype(x.dtype).itemsize
        cost = pl.CostEstimate(
            flops=2 * m_pad * n_pad * k_pad,
            transcendentals=0,
            bytes_accessed=int(xq_pad.size                           # int8 activations
                               + self._wq_pad.size                   # int8 weights
                               + m_pad * n_pad * out_itemsize))      # output

        # Explicit VMEM budget for the chosen tiles: double-buffered int8 input tiles, the
        # accumulator, double-buffered output tile, and the small side inputs; capped at
        # 48 MiB so the same tiles fit v7x's 64 MiB physical VMEM as well as v5e/v6e's 128 MiB.
        vmem_est = (2 * (tm * tk + tk * tn) + tm * tn * 4
                    + 2 * tm * tn * out_itemsize + 2 * (tm * 4 + 2 * tn * 4))
        vmem_limit = int(min(48 * (1 << 20), 2 * vmem_est + (4 << 20)))

        try:
            out = self._matmul(xq_pad, xs_pad, tm, tn, tk, grid, cost, vmem_limit,
                               m_pad, n_pad, x.dtype, self.use_int8_mxu)
        except Exception:
            if not self.use_int8_mxu:
                raise
            # Integer MXU path unavailable on this generation -> portable bf16 path.
            self.use_int8_mxu = False
            out = self._matmul(xq_pad, xs_pad, tm, tn, tk, grid, cost, vmem_limit,
                               m_pad, n_pad, x.dtype, False)

        return out[:M, :N].reshape(*orig_shape[:-1], N)

    def _matmul(self, xq_pad, xs_pad, tm, tn, tk, grid, cost, vmem_limit,
                m_pad, n_pad, out_dtype, use_int8_mxu):
        acc_dtype = jnp.int32 if use_int8_mxu else jnp.float32
        kernel = functools.partial(_w8x8_kernel, use_int8_mxu=use_int8_mxu)
        # TODO(synk): sweep pipeline_mode=pl.Buffered(3) on the activation/weight specs only
        # if a profile shows exposed DMA at large tk (costs extra VMEM on v7x).
        return pl.pallas_call(
            kernel,
            out_shape=jax.ShapeDtypeStruct((m_pad, n_pad), out_dtype),
            grid_spec=pltpu.PrefetchScalarGridSpec(
                num_scalar_prefetch=0,
                grid=grid,
                in_specs=[
                    pl.BlockSpec((tm, tk), lambda i, j, k: (i, k)),   # int8 activation tile
                    pl.BlockSpec((tm, 1), lambda i, j, k: (i, 0)),    # per-row f32 act scale
                    pl.BlockSpec((tk, tn), lambda i, j, k: (k, j)),   # int8 weight tile
                    pl.BlockSpec((2, tn), lambda i, j, k: (0, j)),    # [w_scale; bias] f32
                ],
                out_specs=pl.BlockSpec((tm, tn), lambda i, j, k: (i, j)),
                scratch_shapes=[pltpu.VMEM((tm, tn), acc_dtype)],
            ),
            compiler_params=pltpu.CompilerParams(
                dimension_semantics=("parallel", "parallel", "arbitrary"),
                vmem_limit_bytes=vmem_limit),
            cost_estimate=cost,
        )(xq_pad, xs_pad, self._wq_pad, self._scale_bias)


def _reference(x, mod):
    """Pure-JAX replica of the PyTorch forward (for correctness checking).

    Same quantization math as the kernel wrapper (divide + tiny clamp); the clamp only
    changes behaviour for all-zero rows, where the torch original would produce NaN.  The
    f32 matmul is exact for the integer magnitudes used here, matching the kernel's int32
    (or f32) accumulation.
    """
    if mod.scales is not None:
        x = x / mod.scales
    x_scale = (jnp.max(jnp.abs(x), axis=-1) / 127.0).astype(x.dtype)
    x_scale = jnp.maximum(x_scale, jnp.asarray(jnp.finfo(jnp.float32).tiny, x_scale.dtype))
    x_q = (x / x_scale[..., None]).astype(jnp.int8)
    res_q = x_q.astype(jnp.float32) @ mod.weight_q.astype(jnp.float32)
    mx = x_scale[..., None].astype(jnp.float32) * mod.max_val.astype(jnp.float32)[None, :]
    res = (res_q * mx).astype(x.dtype)
    if mod.bias is not None:
        res = res + mod.bias
    return res


if __name__ == "__main__":
    key = jax.random.PRNGKey(0)
    k_w, k_b, k_x = jax.random.split(key, 3)

    # Small shapes; non-multiple M (2*9=18) and N (200) exercise the padding paths, and
    # block_n=block_k=128 makes the tiny problem still run a (1, 2, 2) tiled grid with the
    # K-axis accumulator.  (Real layers use the defaults block_m=512/block_n=1024/block_k=1024.)
    batch, seq, in_features, out_features = 2, 9, 256, 200
    ori_w = jax.random.normal(k_w, (out_features, in_features), dtype=jnp.float32)
    bias = jax.random.normal(k_b, (out_features,), dtype=jnp.float32)
    x = jax.random.normal(k_x, (batch, seq, in_features), dtype=jnp.float32)

    # act_max=None path (scales=None), as in the module's default construction.
    mod = W8X8Linear(ori_w, bias=bias, act_max=None, block_n=128, block_k=128)

    y = mod(x, block_m=128)
    jax.block_until_ready(y)

    y_ref = _reference(x.reshape(-1, in_features), mod).reshape(batch, seq, out_features)
    assert y.shape == (batch, seq, out_features)
    assert jnp.allclose(y, y_ref, atol=1e-3, rtol=1e-3), "mismatch vs reference"

    print("KERNEL_OK")
</pallas_src>

<mosaic_0001>
module attributes {stable_mosaic.version = 11 : i64} {
  func.func @_w8x8_kernel(%arg0: i32, %arg1: i32, %arg2: i32, %arg3: memref<32x128xi8, #tpu.memory_space<vmem>>, %arg4: memref<32x1xf32, #tpu.memory_space<vmem>>, %arg5: memref<128x128xi8, #tpu.memory_space<vmem>>, %arg6: memref<2x128xf32, #tpu.memory_space<vmem>>, %arg7: memref<32x128xf32, #tpu.memory_space<vmem>>, %arg8: memref<32x128xf32, #tpu.memory_space<vmem>>) attributes {dimension_semantics = [#tpu.dimension_semantics<parallel>, #tpu.dimension_semantics<parallel>, #tpu.dimension_semantics<arbitrary>], iteration_bounds = array<i64: 1, 2, 2>, scalar_prefetch = 0 : i64, scratch_operands = 1 : i64, tpu.core_type = #tpu.core_type<tc>, window_params = [{transform_indices = @transform_0, window_bounds = array<i64: 32, 128>}, {transform_indices = @transform_1, window_bounds = array<i64: 32, 1>}, {transform_indices = @transform_2, window_bounds = array<i64: 128, 128>}, {transform_indices = @transform_3, window_bounds = array<i64: 2, 128>}, {transform_indices = @transform_4, window_bounds = array<i64: 32, 128>}]} {
    %c0_i32 = arith.constant 0 : i32
    %0 = arith.cmpi eq, %arg2, %c0_i32 : i32
    %1 = arith.extui %0 : i1 to i32
    %c0_i32_0 = arith.constant 0 : i32
    %2 = arith.cmpi ne, %1, %c0_i32_0 : i32
    scf.if %2 {
      %cst_9 = arith.constant 0.000000e+00 : f32
      %14 = vector.broadcast %cst_9 : f32 to vector<32x128xf32>
      %c0_10 = arith.constant 0 : index
      %c0_11 = arith.constant 0 : index
      %15 = vector.load %arg8[%c0_10, %c0_11] : memref<32x128xf32, #tpu.memory_space<vmem>>, vector<32x128xf32>
      tpu.vector_store %arg8[%c0_10, %c0_11], %14 {strides = array<i32>} : memref<32x128xf32, #tpu.memory_space<vmem>>, vector<32x128xf32>,
    } else {
    }
    %c0 = arith.constant 0 : index
    %c0_1 = arith.constant 0 : index
    %3 = vector.load %arg8[%c0, %c0_1] : memref<32x128xf32, #tpu.memory_space<vmem>>, vector<32x128xf32>
    %c0_2 = arith.constant 0 : index
    %c0_3 = arith.constant 0 : index
    %4 = vector.load %arg3[%c0_2, %c0_3] : memref<32x128xi8, #tpu.memory_space<vmem>>, vector<32x128xi8>
    %5 = arith.sitofp %4 : vector<32x128xi8> to vector<32x128xbf16>
    %c0_4 = arith.constant 0 : index
    %c0_5 = arith.constant 0 : index
    %6 = vector.load %arg5[%c0_4, %c0_5] : memref<128x128xi8, #tpu.memory_space<vmem>>, vector<128x128xi8>
    %7 = arith.sitofp %6 : vector<128x128xi8> to vector<128x128xbf16>
    %cst = arith.constant dense<0.000000e+00> : vector<32x128xf32>
    %8 = tpu.matmul %5, %7, %cst {dimension_numbers = #tpu.dot_dimension_numbers<[1], [0], [0], [1], [0, 0, 1, 1], [], []>} : vector<32x128xbf16>, vector<128x128xbf16>, vector<32x128xf32> -> vector<32x128xf32>
    %9 = arith.addf %3, %8 : vector<32x128xf32>
    %c0_6 = arith.constant 0 : index
    %c0_7 = arith.constant 0 : index
    %10 = vector.load %arg8[%c0_6, %c0_7] : memref<32x128xf32, #tpu.memory_space<vmem>>, vector<32x128xf32>
    tpu.vector_store %arg8[%c0_6, %c0_7], %9 {strides = array<i32>} : memref<32x128xf32, #tpu.memory_space<vmem>>, vector<32x128xf32>,
    %c1_i32 = arith.constant 1 : i32
    %11 = arith.cmpi eq, %arg2, %c1_i32 : i32
    %12 = arith.extui %11 : i1 to i32
    %c0_i32_8 = arith.constant 0 : i32
    %13 = arith.cmpi ne, %12, %c0_i32_8 : i32
    scf.if %13 {
      %c0_9 = arith.constant 0 : index
      %c0_10 = arith.constant 0 : index
      %14 = vector.load %arg6[%c0_9, %c0_10] : memref<2x128xf32, #tpu.memory_space<vmem>>, vector<1x128xf32>
      %c1 = arith.constant 1 : index
      %c0_11 = arith.constant 0 : index
      %15 = vector.load %arg6[%c1, %c0_11] : memref<2x128xf32, #tpu.memory_space<vmem>>, vector<1x128xf32>
      %c0_12 = arith.constant 0 : index
      %c0_13 = arith.constant 0 : index
      %16 = vector.load %arg4[%c0_12, %c0_13] : memref<32x1xf32, #tpu.memory_space<vmem>>, vector<32x1xf32>
      %17 = vector.broadcast %16 : vector<32x1xf32> to vector<32x128xf32>
      %18 = vector.broadcast %14 : vector<1x128xf32> to vector<32x128xf32>
      %19 = arith.mulf %17, %18 : vector<32x128xf32>
      %c0_14 = arith.constant 0 : index
      %c0_15 = arith.constant 0 : index
      %20 = vector.load %arg8[%c0_14, %c0_15] : memref<32x128xf32, #tpu.memory_space<vmem>>, vector<32x128xf32>
      %21 = arith.mulf %20, %19 : vector<32x128xf32>
      %22 = vector.broadcast %15 : vector<1x128xf32> to vector<32x128xf32>
      %23 = arith.addf %21, %22 : vector<32x128xf32>
      %c0_16 = arith.constant 0 : index
      %c0_17 = arith.constant 0 : index
      %24 = vector.load %arg7[%c0_16, %c0_17] : memref<32x128xf32, #tpu.memory_space<vmem>>, vector<32x128xf32>
      tpu.vector_store %arg7[%c0_16, %c0_17], %23 {strides = array<i32>} : memref<32x128xf32, #tpu.memory_space<vmem>>, vector<32x128xf32>,
    } else {
    }
    return
  }
  func.func @transform_0(%arg0: i32, %arg1: i32, %arg2: i32) -> (i32, i32) {
    %c0_i32 = arith.constant 0 : i32
    return %arg0, %arg2 : i32, i32
  }
  func.func @transform_1(%arg0: i32, %arg1: i32, %arg2: i32) -> (i32, i32) {
    %c0_i32 = arith.constant 0 : i32
    %c0_i32_0 = arith.constant 0 : i32
    return %arg0, %c0_i32 : i32, i32
  }
  func.func @transform_2(%arg0: i32, %arg1: i32, %arg2: i32) -> (i32, i32) {
    %c0_i32 = arith.constant 0 : i32
    return %arg2, %arg1 : i32, i32
  }
  func.func @transform_3(%arg0: i32, %arg1: i32, %arg2: i32) -> (i32, i32) {
    %c0_i32 = arith.constant 0 : i32
    %c0_i32_0 = arith.constant 0 : i32
    return %c0_i32, %arg1 : i32, i32
  }
  func.func @transform_4(%arg0: i32, %arg1: i32, %arg2: i32) -> (i32, i32) {
    %c0_i32 = arith.constant 0 : i32
    return %arg0, %arg1 : i32, i32
  }
}

</mosaic_0001>

<bundles_post_ra>
// kernel: tpu_custom_call.1
= control target key start
LH: loop header
LB: loop body
LE: loop exit
PB: predicated region body
PF: predicated region fallthrough
CT: control target
= control target key end

     0   :  { %9 = vsyncpa [#allocation4], 0  ;;  %s1159_s0 = inlined_call_operand.vmem [shape: s8[32,256], index: 0, kind: input, shape index: {}]   ;;  %s1160_s1 = inlined_call_operand.vmem [shape: f32[32,1], index: 1, kind: input, shape index: {}]   ;;  %s1161_s2 = inlined_call_operand.hbm [shape: s8[256,256], index: 2, kind: input, shape index: {}]   ;;  %s1162_s3 = inlined_call_operand.vmem [shape: f32[2,256], index: 3, kind: input, shape index: {}]   ;;  %s1163_s4 = inlined_call_operand.hbm [shape: f32[32,256], index: 4, kind: output, shape index: {}]  }
   0x1   :  { %11 = vsyncpa [#allocation4 + $0x1], 0 }
   0x2   :  { %12 = vsyncpa [#allocation5], 0 }
   0x3   :  { %14 = vsyncpa [#allocation5 + $0x1], 0  ;;  %s945_s15 = smov 0   ;;  %s947_s16 = smov 0  }
   0x4   :  { %s949_s17 = smov 0   ;;  %s951_s18 = smov 0  }
   0x5   :  { %s953_s19 = smov 0   ;;  %s955_s20 = smov 0  }
   0x6   :  { %s957_s21 = smov 0   ;;  %s959_s22 = smov 0  }
   0x7   :  { %s961_s23 = smov 0   ;;  %s963_s24 = smov 0  }
   0x8   :  { %s965_s25 = smov 0  }
   0x9 LB: > { %1169 = sst [smem:[#allocation9_spill]] %s878_s17  ;;  %s615_s26 = sadd.s32 4294967295, %s910_s25   ;;  %s910_s25 = sphi %s965_s25, %s20_s25   ;;  %s906_s24 = sphi %s963_s24, %s1194_s24   ;;  %s902_s23 = sphi %s961_s23, %s1193_s23   ;;  %s898_s22 = sphi %s959_s22, %s1192_s22   ;;  %s894_s21 = sphi %s957_s21, %s1191_s21   ;;  %s890_s20 = sphi %s955_s20, %s1184_s20   ;;  %s886_s19 = sphi %s953_s19, %s1190_s19   ;;  %s882_s18 = sphi %s951_s18, %s1189_s18   ;;  %s878_s17 = sphi %s949_s17, %s1182_s17   ;;  %s874_s16 = sphi %s947_s16, %s1188_s16   ;;  %s870_s15 = sphi %s945_s15, %s1187_s15  }
   0xa   : > { %1170 = sst [smem:[#allocation10_spill]] %s890_s20  ;;  %s616_s27 = sadd.s32 4294967294, %s910_s25  }
   0xb   : > { %s32_s28 = sadd.s32 1, %s902_s23  ;;  %s35_s29 = sadd.s32 1, %s906_s24 }
   0xc   : > { %p33_p0 = scmp.ge.s32.totalorder %s32_s28, 2  ;;  %s102_s30 = sadd.s32 1, %s890_s20 }
   0xd   : > { %p109_p1 = scmp.ne.s32.totalorder %s890_s20, %s886_s19  ;;  %p110_p2 = scmp.eq.s32.totalorder %s910_s25, 0 }
   0xe   : > { %s1196_s28 = smov (%p33_p0, %s32_s28), 0  ;;  %s1198_s29 = smov (!%p33_p0, %s35_s29), %s906_s24 }
   0xf   : > { %1171 = sst [smem:[#allocation11_spill]] %s1196_s28  ;;  %s97_s5 = ssub.s32 %s902_s23, %s1196_s28 }
  0x10   : > { %p1011_p3 = por %p110_p2, %p109_p1  ;;  %p37_p4 = scmp.ge.s32.totalorder %s1198_s29, 2 }
  0x11   : > { %p115_p5 = scmp.ne.s32.totalorder %s886_s19, %s882_s18  ;;  %p116_p6 = scmp.eq.s32.totalorder %s615_s26, 0 }
  0x12   : > { %s156_s7 = sadd.s32 1, %s878_s17  ;;  %s1200_s29 = smov (%p37_p4, %s1198_s29), 0 }
  0x13   : > { %1173 = sst [smem:[#allocation12_spill]] %s1200_s29  ;;  %p1019_p7 = por %p116_p6, %p115_p5 }
  0x14   : > { %p166_p8 = scmp.ne.s32.totalorder %s878_s17, %s874_s16  ;;  %s98_s9 = ssub.s32 %s906_s24, %s1200_s29 }
  0x15   : > { %p167_p9 = scmp.eq.s32.totalorder %s615_s26, 3  ;;  %s99_s10 = sor.u32 %s98_s9, %s97_s5 }
  0x16   : > { %p154_p10 = scmp.eq.s32.totalorder %s98_s9, 0  ;;  %p100_p11 = scmp.eq.s32.totalorder %s99_s10, 0 }
  0x17   : > { %p1027_p12 = por %p167_p9, %p166_p8  ;;  %p172_p13 = scmp.ne.s32.totalorder %s874_s16, %s870_s15 }
  0x18   : > { %s1032_s12 = scalar_select %p154_p10, %s878_s17, %s156_s7  }
  0x19   : > { %s1035_s13 = scalar_select %p100_p11, %s890_s20, %s102_s30  }
  0x1a   : > { %1176 = sst [smem:[#allocation13_spill]] %s1032_s12  ;;  %p173_p0 = scmp.eq.s32.totalorder %s616_s27, 3 }
  0x1b   : > { %1177 = sst [smem:[#allocation14_spill]] %s1035_s13  ;;  %p656_p1 = scmp.lt.s32.totalorder %s910_s25, 4 }
  0x1c   : > { %p1040_p2 = por %p173_p0, %p172_p13  ;;  %s213_s18 = sand.u32 1, %s890_s20  }
  0x1d   : > { %s620_s26 = sshll.u32 %s213_s18, 5  ;;  %s635_s5 = sshll.u32 %s902_s23, 3 }
  0x1e   : > { %s1178_s14 = scalar_select %p1040_p2, 1, 0 }
  0x1f   : > { %s222_s9 = sadd.s32 %s906_s24, %s635_s5  ;;  %s217_s10 = scalar_lea.vmem [#allocation3], %s620_s26 }
  0x20   : > { %1179 = sst [smem:[#allocation15_spill]] %s1178_s14  ;;  %s227_s29 = sshll.u32 %s217_s10, 4  ;;  %s228_s29 = int_to_ptr.vmem [resolvable:$true] %s227_s29 }
  0x21   : > { %s623_s28 = sshll.u32 %s222_s9, 3  ;;  %p649_p4 = pnand %p656_p1, %p1011_p3 }
  0x22   : > { %s224_s13 = scalar_lea.hbm %s1161_s2, %s623_s28  ;;  %s214_s12 = scalar_lea.sflag [#allocation4], %s213_s18 }
  0x23   : > { %s225_s27 = sshll.u32 %s224_s13, 4  ;;  %s912_s17 = smov 256   ;;  %s226_s27 = int_to_ptr.hbm [resolvable:$true] %s225_s27 }
  0x24   : > { %s913_s20 = smov 128   ;;  %s914_s14 = smov 8  }
  0x25   : > { %651 = dma.hbm_to_vmem [thread:$0]  (!%p649_p4), %s226_s27, 512, %s228_s29, %s214_s12, %s912_s17, %s913_s20, %s914_s14  }
  0x26   : > { %p624_p5 = scmp.ge.s32.totalorder %s910_s25, 1  ;;  %p242_p6 = scmp.lt.s32.totalorder %s910_s25, 5 }
  0x28   : > { %p243_p8 = pnand %p624_p5, %p242_p6 }
  0x29   : > { %s248_s26 = sand.u32 (!%p243_p8), 1, %s886_s19  }
  0x2a   : > { %246 = sbr.rel (%p243_p8) target bundleno = 392 (0x188), region = 36  ;;  %s625_s5 = sshll.u32 (!%p243_p8), %s248_s26, 5 }
  0x2b   : > { %s249_s9 = scalar_lea.sflag (!%p243_p8), [#allocation4], %s248_s26  ;;  %s1055_s10 = scalar_lea.vmem (!%p243_p8), [#allocation3], %s625_s5 }
  0x2f   : > { %861 = dma.done.wait (%p1019_p7), %s249_s9, 512  }
  0x30   : > { %863 = vsyncadd (%p1019_p7), %s249_s9, 4294966784  ;;  %s292_s17 = sand.u32 1, %s874_s16   ;;  %p297_p3 = scmp.lt.s32.totalorder %s894_s21, 1 }
  0x31   : > { %s626_s20 = sshll.u32 %s292_s17, 5  ;;  %p310_p9 = scmp.lt.s32.totalorder %s898_s22, 1 }
  0x32   : > { %s298_s28 = scalar_select %p297_p3, %s894_s21, 1 }
  0x33   : > { %s311_s29 = scalar_select %p310_p9, %s898_s22, 1 }
  0x34   : > { %s627_s6 = sshll.u32 %s298_s28, 3  ;;  %s1078_s27 = scalar_lea.vmem [#allocation6], %s626_s20 }
  0x35   : > { %s1071_s14 = scalar_lea.vmem %s1159_s0, %s627_s6  ;;  %s628_s8 = sshll.u32 %s311_s29, 1 }
  0x36   : > { %s1076_s30 = scalar_lea.vmem %s1162_s3, %s628_s8  ;;  %p629_p7 = scmp.ne.s32.totalorder %s894_s21, 0 }
  0x38   : > { %318 = sbr.rel (%p629_p7) target bundleno = 66 (0x42), region = 44 }
  0x3d   : > { %v915_v0 = vmov 0.0  }
  0x3e   : > { %319 = vst [vmem:[#allocation2 + $0x10] sm:$0xff] %v915_v0 }
  0x3f   : > { %320 = vst [vmem:[#allocation2] sm:$0xff] %v915_v0 }
  0x40   : > { %321 = vst [vmem:[#allocation2 + $0x18] sm:$0xff] %v915_v0 }
  0x41   : > { %322 = vst [vmem:[#allocation2 + $0x8] sm:$0xff] %v915_v0 }
  0x42 PF: > { %v341_v1 = vld [vmem:[%s1055_s10 + $0x18] sm:$0xff]  ;;  %v340_v2 = vld [vmem:[%s1055_s10 + $0x10] sm:$0xff]  ;;  %v339_v19 = vld [vmem:[%s1055_s10 + $0x8] sm:$0xff]  ;;  %p630_p10 = scmp.ne.s32.totalorder %s894_s21, 1 }
  0x43   : > { %v356_v3 = vunpack.c.2.s8 %v341_v1  ;;  %v357_v4 = vunpack.c.3.s8 %v341_v1  ;;  %v354_v5 = vunpack.c.0.s8 %v341_v1  ;;  %v355_v6 = vunpack.c.1.s8 %v341_v1  ;;  %v338_v30 = vld [vmem:[%s1055_s10] sm:$0xff] }
  0x44   : > { %v352_v7 = vunpack.c.2.s8 %v340_v2  ;;  %v353_v8 = vunpack.c.3.s8 %v340_v2  ;;  %v350_v14 = vunpack.c.0.s8 %v340_v2  ;;  %v351_v15 = vunpack.c.1.s8 %v340_v2  ;;  %v327_v41 = vld [vmem:[%s1071_s14] sm:$0xff] }
  0x45   : > { %v372_v9 = vcvt.s32.f32 %v356_v3  ;;  %v373_v10 = vcvt.s32.f32 %v357_v4  ;;  %v370_v11 = vcvt.s32.f32 %v354_v5  ;;  %v371_v12 = vcvt.s32.f32 %v355_v6  ;;  %v323_v56 = vld [vmem:[#allocation2 + $0x10] sm:$0xff] }
  0x46   : > { %v368_v17 = vcvt.s32.f32 %v352_v7  ;;  %v369_v18 = vcvt.s32.f32 %v353_v8  ;;  %v366_v20 = vcvt.s32.f32 %v350_v14  ;;  %v367_v21 = vcvt.s32.f32 %v351_v15  ;;  %v324_v62 = vld [vmem:[#allocation2] sm:$0xff] }
  0x47   : > { %v381_v13 = vpack.c.bf16 %v373_v10, %v372_v9  ;;  %v380_v16 = vpack.c.bf16 %v371_v12, %v370_v11  ;;  %v348_v23 = vunpack.c.2.s8 %v339_v19  ;;  %v349_v24 = vunpack.c.3.s8 %v339_v19  ;;  %v325_v57 = vld [vmem:[#allocation2 + $0x18] sm:$0xff] }
  0x48   : > { %v379_v22 = vpack.c.bf16 %v369_v18, %v368_v17  ;;  %v378_v25 = vpack.c.bf16 %v367_v21, %v366_v20  ;;  %v346_v28 = vunpack.c.0.s8 %v339_v19  ;;  %v347_v29 = vunpack.c.1.s8 %v339_v19  ;;  %v326_v63 = vld [vmem:[#allocation2 + $0x8] sm:$0xff] }
  0x49   : > { %382 = vmatpush.bf16.msra.mxu0 %v381_v13  ;;  %636 = vmatpush.bf16.msra.mxu1 %v381_v13  ;;  %v364_v26 = vcvt.s32.f32 %v348_v23  ;;  %v365_v27 = vcvt.s32.f32 %v349_v24  ;;  %v344_v31 = vunpack.c.2.s8 %v338_v30  ;;  %v345_v35 = vunpack.c.3.s8 %v338_v30 }
  0x4a   : > { %v362_v33 = vcvt.s32.f32 %v346_v28  ;;  %v363_v34 = vcvt.s32.f32 %v347_v29  ;;  %v342_v36 = vunpack.c.0.s8 %v338_v30  ;;  %v343_v40 = vunpack.c.1.s8 %v338_v30 }
  0x4b   : > { %v377_v32 = vpack.c.bf16 %v365_v27, %v364_v26  ;;  %v360_v38 = vcvt.s32.f32 %v344_v31  ;;  %v361_v39 = vcvt.s32.f32 %v345_v35  ;;  %v328_v42 = vunpack.c.0.s8 %v327_v41 }
  0x4c   : > { %v376_v37 = vpack.c.bf16 %v363_v34, %v362_v33  ;;  %v329_v43 = vunpack.c.1.s8 %v327_v41  ;;  %v330_v44 = vunpack.c.2.s8 %v327_v41  ;;  %v331_v45 = vunpack.c.3.s8 %v327_v41 }
  0x4d   : > { %383 = vmatpush.bf16.msra.mxu0 %v380_v16  ;;  %637 = vmatpush.bf16.msra.mxu1 %v380_v16  ;;  %v375_v46 = vpack.c.bf16 %v361_v39, %v360_v38  ;;  %v358_v47 = vcvt.s32.f32 %v342_v36  ;;  %v359_v48 = vcvt.s32.f32 %v343_v40  ;;  %v332_v49 = vcvt.s32.f32 %v328_v42 }
  0x4e   : > { %v333_v50 = vcvt.s32.f32 %v329_v43  ;;  %v334_v51 = vcvt.s32.f32 %v330_v44  ;;  %v335_v52 = vcvt.s32.f32 %v331_v45 }
  0x4f   : > { %v374_v53 = vpack.c.bf16 %v359_v48, %v358_v47 }
  0x50   : > { %v336_v54 = vpack.c.bf16 %v333_v50, %v332_v49  ;;  %v337_v55 = vpack.c.bf16 %v335_v52, %v334_v51 }
  0x51   : > { %384 = vmatpush.bf16.msra.mxu0 %v379_v22  ;;  %638 = vmatpush.bf16.msra.mxu1 %v379_v22 }
  0x55   : > { %385 = vmatpush.bf16.msra.mxu0 %v378_v25  ;;  %639 = vmatpush.bf16.msra.mxu1 %v378_v25 }
  0x59   : > { %386 = vmatpush.bf16.msra.mxu0 %v377_v32  ;;  %640 = vmatpush.bf16.msra.mxu1 %v377_v32 }
  0x5d   : > { %387 = vmatpush.bf16.msra.mxu0 %v376_v37  ;;  %641 = vmatpush.bf16.msra.mxu1 %v376_v37 }
  0x61   : > { %388 = vmatpush.bf16.msra.mxu0 %v375_v46  ;;  %642 = vmatpush.bf16.msra.mxu1 %v375_v46 }
  0x65   : > { %389 = vmatpush.bf16.msra.mxu0 %v374_v53  ;;  %643 = vmatpush.bf16.msra.mxu1 %v374_v53 }
  0x68   : > { %390 = vmatmul.bf16.vlgmr.msra.gmra.mxu0 %v336_v54  ;;  %395 = vmatmul.bf16.vlgmr.msra.gmra.mxu1 %v337_v55 }
  0xe5   : > { %v391_v58 = vpop.f32.mrf.mxu0  ;;  %v396_v59 = vpop.f32.mrf.mxu1 }
  0xe6   : > { %v401_v60 = vadd.f32 %v391_v58, %v323_v56  ;;  %v403_v61 = vadd.f32 %v396_v59, %v325_v57 }
  0xe8   : > { %405 = vst [vmem:[#allocation2 + $0x10] sm:$0xff] %v401_v60 }
  0xe9   : > { %407 = vst [vmem:[#allocation2 + $0x18] sm:$0xff] %v403_v61 }
  0xed   : > { %v393_v0 = vpop.f32.mrf.mxu0  ;;  %v398_v1 = vpop.f32.mrf.mxu1  ;;  %412 = sbr.rel (%p630_p10) target bundleno = 375 (0x177), region = 48 }
  0xee   : > { %v402_v2 = vadd.f32 %v393_v0, %v324_v62  ;;  %v404_v3 = vadd.f32 %v398_v1, %v326_v63 }
  0xf0   : > { %406 = vst [vmem:[#allocation2] sm:$0xff] %v402_v2 }
  0xf1   : > { %408 = vst [vmem:[#allocation2 + $0x8] sm:$0xff] %v404_v3 }
  0xf2   : > { %v417_v4 = vld [vmem:[%s1160_s1 + $0x10] sm:$0xff]  ;;  %v415_v5 = vld [vmem:[%s1160_s1] sm:$0xff]  ;;  %v916_v6 = vmov 0   ;;  %v418_v7 = vld [vmem:[%s1160_s1 + $0x18] sm:$0xff] }
  0xf3   : > { %755 = vset.pattern.permute.xlu1 %v916_v6  ;;  %754 = vset.pattern.permute.xlu0 %v916_v6  ;;  %v416_v8 = vld [vmem:[%s1160_s1 + $0x8] sm:$0xff]  ;;  %v756_v9 = vld [vmem:[%s1076_s30] ss:$0 sm:$0xff]  ;;  %v446_v10 = vld [vmem:[#allocation2 + $0x18] sm:$0xff] }
  0xf4   : > { %431 = vperm.xlu1 %755, %v417_v4   ;;  %421 = vperm.xlu0 %754, %v415_v5   ;;  %v444_v12 = vld [vmem:[#allocation2 + $0x10] sm:$0xff]  ;;  %v757_v15 = vld [vmem:[%s1076_s30 + $0x1] ss:$0 sm:$0xff] }
  0xf7   : > { %v445_v23 = vld [vmem:[#allocation2] sm:$0xff] }
  0xf8   : > { %v447_v21 = vld [vmem:[#allocation2 + $0x8] sm:$0xff] }
  0xfc   : > { %436 = vperm.xlu1 %755, %v418_v7   ;;  %426 = vperm.xlu0 %754, %v416_v8  }
 0x166   : > { %v432_v11 = vpop.permute.xlu1 %431  ;;  %v422_v13 = vpop.permute.xlu0 %421 }
 0x167   : > { %v442_v14 = vmul.f32 %v756_v9, %v432_v11  ;;  %v440_v16 = vmul.f32 %v756_v9, %v422_v13 }
 0x169   : > { %v450_v17 = vmul.f32 %v446_v10, %v442_v14  ;;  %v448_v18 = vmul.f32 %v444_v12, %v440_v16 }
 0x16b   : > { %v455_v19 = vadd.f32 %v757_v15, %v450_v17  ;;  %v453_v20 = vadd.f32 %v757_v15, %v448_v18 }
 0x16d   : > { %459 = vst [vmem:[%s1078_s27 + $0x10] sm:$0xff] %v455_v19 }
 0x16e   : > { %457 = vst [vmem:[%s1078_s27] sm:$0xff] %v453_v20  ;;  %v437_v22 = vpop.permute.xlu1 %436  ;;  %v427_v24 = vpop.permute.xlu0 %426 }
 0x16f   : > { %v443_v25 = vmul.f32 %v756_v9, %v437_v22  ;;  %v441_v26 = vmul.f32 %v756_v9, %v427_v24 }
 0x171   : > { %v451_v27 = vmul.f32 %v447_v21, %v443_v25  ;;  %v449_v28 = vmul.f32 %v445_v23, %v441_v26 }
 0x173   : > { %v456_v29 = vadd.f32 %v757_v15, %v451_v27  ;;  %v454_v30 = vadd.f32 %v757_v15, %v449_v28 }
 0x175   : > { %460 = vst [vmem:[%s1078_s27 + $0x18] sm:$0xff] %v456_v29 }
 0x176   : > { %458 = vst [vmem:[%s1078_s27 + $0x8] sm:$0xff] %v454_v30 }
 0x177 PF: > { %s632_s6 = sshll.u32 %s898_s22, 3  ;;  %s476_s8 = sshll.u32 %s1078_s27, 4  ;;  %s477_s8 = int_to_ptr.vmem [resolvable:$true] %s476_s8 }
 0x178   : > { %s475_s14 = scalar_lea.hbm %s1163_s4, %s632_s6  ;;  %s462_s7 = scalar_lea.sflag [#allocation5], %s292_s17 }
 0x179   : > { %s478_s18 = sshll.u32 %s475_s14, 4  ;;  %s808_s22 = scalar_lea.hbm %s1163_s4, 64  ;;  %s479_s18 = int_to_ptr.hbm [resolvable:$true] %s478_s18 }
 0x17a   : > { %s802_s30 = sshra.s32 %s479_s18, 4  ;;  %s803_s30 = int_to_ptr.hbm [resolvable:$true] %s802_s30 }
 0x17b   : > { %s804_s26 = scalar_lea.hbm %s803_s30, 32  ;;  %p809_p1 = scmp.lt.s32.totalorder %s803_s30, %s1163_s4 }
 0x17c   : > { %p805_p11 = scmp.ne.s32.totalorder %s803_s30, %s804_s26  ;;  %p810_p4 = scmp.lt.s32.totalorder %s808_s22, %s804_s26 }
 0x17e   : > { %p806_p13 = pnand %p805_p11, %p1027_p12  ;;  %p811_p5 = por %p810_p4, %p809_p1 }
 0x180   : > { %p807_p0 = pneg %p806_p13 }
 0x182   : > { %p812_p6 = pnand %p811_p5, %p807_p0 }
 0x184   : > { %815 = shalt.err (!%p812_p6)
}
 0x185   : > { %s917_s17 = smov 128   ;;  %s918_s27 = smov 256  }
 0x186   : > { %s919_s28 = smov 8  }
 0x187   : > { %646 = dma.vmem_to_hbm [thread:$0]  (%p1027_p12), %s477_s8, 512, %s479_s18, %s462_s7, %s917_s17, %s918_s27, %s919_s28  }
 0x188 PF: > { %p657_p8 = scmp.ge.s32.totalorder %s910_s25, 2  ;;  %s493_s29 = sand.u32 1, %s870_s15  }
 0x189   : > { %s494_s6 = scalar_lea.sflag [#allocation5], %s493_s29 }
 0x18a   : > { %p653_p3 = pnand %p657_p8, %p1040_p2 }
 0x18c   : > { %p654_p9 = pneg %p653_p3 }
 0x18e   : > { %865 = dma.done.wait (%p654_p9), %s494_s6, 512  }
 0x18f   : > { %867 = vsyncadd (%p654_p9), %s494_s6, 4294966784  ;;  %s20_s25 = sadd.s32 1, %s910_s25   ;;  %s1181_s12 = sld [smem:[#allocation9_spill]] }
 0x190   : > { %p17_p7 = scmp.ge.s32.totalorder %s20_s25, 6   ;;  %s1182_s17 = sld [smem:[#allocation13_spill]] }
 0x191   : > { %s1183_s11 = sld [smem:[#allocation10_spill]]  ;;  %s1187_s15 = smov %s874_s16 }
 0x192   : > { %s1184_s20 = sld [smem:[#allocation14_spill]]  ;;  %s1189_s18 = smov %s886_s19 }
 0x193   : > { %s1185_s13 = sld [smem:[#allocation11_spill]]  ;;  %s1191_s21 = smov %s902_s23 }
 0x194   : > { %s1186_s14 = sld [smem:[#allocation12_spill]]  ;;  %s1192_s22 = smov %s906_s24 }
 0x195   : > { %s1188_s16 = smov %s1181_s12 }
 0x196   :  { %19 = sbr.rel (!%p17_p7) target bundleno = 9 (0x9), region = 98 }
 0x197   : > { %s1190_s19 = smov %s1183_s11 }
 0x199   : > { %s1193_s23 = smov %s1185_s13 }
 0x19a   : > { %s1194_s24 = smov %s1186_s14 }
 0x19b   :  { %500 = vsyncpa [#allocation4], 1 }
 0x19c   :  { %502 = vsyncpa [#allocation4 + $0x1], 1 }
 0x19d   :  { %503 = vsyncpa [#allocation5], 1 }
 0x19e   :  { %505 = vsyncpa [#allocation5 + $0x1], 1 }

</bundles_post_ra>
